<compile_context>
chip_gen: v6e
topology: v6e:2x2x1
jax: 0.10.0
libtpu: 0.0.40
codegen_flags: <defaults>
</compile_context>

<pallas_src>
import functools

import jax
import jax.numpy as jnp
from jax.experimental import pallas as pl
from jax.experimental.pallas import tpu as pltpu

NUM_NEURONS = 16
NUM_LAYERS = 7            # input linear (bias) + 6 hidden linears (no bias)
NUM_HIDDEN = NUM_LAYERS - 1
IN_DIM = 2
OUT_DIM = 3
LANE = 128                # TPU lane width; batch tiles are multiples of this


def _round_up(a, b):
    return ((a + b - 1) // b) * b


def _mlp_kernel(x_ref, w_in_ref, b_in_ref, w_hid_ref, w_out_ref, o_ref,
                *, compute_dtype):
    """One batch tile of the full MLP, batch on the lane axis.

    x_ref     : (IN_DIM, TILE)                          VMEM
    w_in_ref  : (NUM_NEURONS, IN_DIM)                   VMEM  (PyTorch (out,in))
    b_in_ref  : (NUM_NEURONS, 1)                        VMEM
    w_hid_ref : (NUM_HIDDEN, NUM_NEURONS, NUM_NEURONS)  VMEM  (PyTorch (out,in))
    w_out_ref : (OUT_DIM, NUM_NEURONS)                  VMEM  (PyTorch (out,in))
    o_ref     : (OUT_DIM, TILE)                         VMEM
    """
    h = x_ref[...].astype(compute_dtype)

    # Input layer: Linear(2 -> 16, bias=True) + tanh.
    h = jnp.dot(w_in_ref[...].astype(compute_dtype), h,
                preferred_element_type=jnp.float32)
    h = jnp.tanh((h + b_in_ref[...]).astype(compute_dtype))

    # Hidden layers: 6 x [Linear(16 -> 16, bias=False) + tanh].
    for l in range(NUM_HIDDEN):          # static unroll, small fixed depth
        w = w_hid_ref[l].astype(compute_dtype)
        h = jnp.dot(w, h, preferred_element_type=jnp.float32)
        h = jnp.tanh(h.astype(compute_dtype))

    # Output layer: Linear(16 -> 3, bias=False), no activation.
    o_ref[...] = jnp.dot(w_out_ref[...].astype(compute_dtype), h,
                         preferred_element_type=jnp.float32)


@functools.partial(jax.jit, static_argnames=("tile_b", "compute_dtype"))
def mlp_forward(x, w_in, b_in, w_hid, w_out, *, tile_b=1024,
                compute_dtype=jnp.float32):
    """x: (batch, 2) float32 -> (batch, 3) float32."""
    assert x.ndim == 2 and x.shape[1] == IN_DIM
    assert tile_b % LANE == 0
    batch = x.shape[0]

    # Lane-aligned padded batch; target >= 2 tiles (both v7x TensorCores),
    # capped at tile_b lanes per tile.
    padded = _round_up(batch, LANE)
    tile = min(tile_b, _round_up(max(padded // 2, 1), LANE))
    padded = _round_up(padded, tile)
    grid = padded // tile

    # Batch on the lane axis; pad with zeros (sliced away after the call).
    x_t = x.astype(jnp.float32).T                    # (IN_DIM, batch)
    if padded != batch:
        x_t = jnp.pad(x_t, ((0, 0), (0, padded - batch)))

    matmul_flops = 2 * padded * (IN_DIM * NUM_NEURONS
                                 + NUM_HIDDEN * NUM_NEURONS * NUM_NEURONS
                                 + NUM_NEURONS * OUT_DIM)
    weight_elems = (NUM_NEURONS * IN_DIM + NUM_NEURONS
                    + NUM_HIDDEN * NUM_NEURONS * NUM_NEURONS
                    + OUT_DIM * NUM_NEURONS)
    cost = pl.CostEstimate(
        flops=matmul_flops + padded * NUM_NEURONS,
        transcendentals=padded * NUM_NEURONS * (1 + NUM_HIDDEN),
        bytes_accessed=4 * (padded * (IN_DIM + OUT_DIM) + weight_elems),
    )

    out_t = pl.pallas_call(
        functools.partial(_mlp_kernel, compute_dtype=compute_dtype),
        out_shape=jax.ShapeDtypeStruct((OUT_DIM, padded), jnp.float32),
        grid_spec=pl.GridSpec(
            grid=(grid,),
            in_specs=[
                pl.BlockSpec((IN_DIM, tile), lambda i: (0, i)),
                pl.BlockSpec((NUM_NEURONS, IN_DIM), lambda i: (0, 0)),
                pl.BlockSpec((NUM_NEURONS, 1), lambda i: (0, 0)),
                pl.BlockSpec((NUM_HIDDEN, NUM_NEURONS, NUM_NEURONS),
                             lambda i: (0, 0, 0)),
                pl.BlockSpec((OUT_DIM, NUM_NEURONS), lambda i: (0, 0)),
            ],
            out_specs=pl.BlockSpec((OUT_DIM, tile), lambda i: (0, i)),
        ),
        compiler_params=pltpu.CompilerParams(
            dimension_semantics=("parallel",)),
        cost_estimate=cost,
    )(x_t, w_in, b_in, w_hid, w_out)

    return out_t[:, :batch].T                        # (batch, OUT_DIM)


def init_params(key):
    """PyTorch nn.Linear default init, weights kept in PyTorch (out, in) order."""
    k_in_w, k_in_b, k_hid, k_out = jax.random.split(key, 4)

    bound_in = 1.0 / jnp.sqrt(jnp.float32(IN_DIM))
    w_in = jax.random.uniform(k_in_w, (NUM_NEURONS, IN_DIM), jnp.float32,
                              -bound_in, bound_in)
    b_in = jax.random.uniform(k_in_b, (NUM_NEURONS, 1), jnp.float32,
                              -bound_in, bound_in)

    bound_h = 1.0 / jnp.sqrt(jnp.float32(NUM_NEURONS))
    w_hid = jax.random.uniform(k_hid, (NUM_HIDDEN, NUM_NEURONS, NUM_NEURONS),
                               jnp.float32, -bound_h, bound_h)
    w_out = jax.random.uniform(k_out, (OUT_DIM, NUM_NEURONS), jnp.float32,
                               -bound_h, bound_h)
    return w_in, b_in, w_hid, w_out


def reference_forward(x, w_in, b_in, w_hid, w_out):
    h = jnp.tanh(x @ w_in.T + b_in[:, 0])
    for l in range(NUM_HIDDEN):
        h = jnp.tanh(h @ w_hid[l].T)
    return h @ w_out.T


if __name__ == "__main__":
    key = jax.random.PRNGKey(0)
    k_params, k_x = jax.random.split(key)
    params = init_params(k_params)

    # Exercise both a non-lane-aligned batch (padding path, 2 small tiles)
    # and a larger multi-tile batch.
    for batch in (200, 2048):
        x = jax.random.normal(jax.random.fold_in(k_x, batch),
                              (batch, IN_DIM), jnp.float32)
        out = jax.block_until_ready(mlp_forward(x, *params))
        ref = reference_forward(x, *params)
        assert out.shape == (batch, OUT_DIM)
        assert jnp.allclose(out, ref, atol=1e-5, rtol=1e-5), \
            f"mismatch at batch={batch}"

    print("KERNEL_OK")
</pallas_src>

<mosaic_0001>
module attributes {stable_mosaic.version = 11 : i64} {
  func.func @_mlp_kernel(%arg0: i32, %arg1: memref<2x128xf32, #tpu.memory_space<vmem>>, %arg2: memref<16x2xf32, #tpu.memory_space<vmem>>, %arg3: memref<16x1xf32, #tpu.memory_space<vmem>>, %arg4: memref<6x16x16xf32, #tpu.memory_space<vmem>>, %arg5: memref<3x16xf32, #tpu.memory_space<vmem>>, %arg6: memref<3x128xf32, #tpu.memory_space<vmem>>) attributes {dimension_semantics = [#tpu.dimension_semantics<parallel>], iteration_bounds = array<i64: 2>, scalar_prefetch = 0 : i64, scratch_operands = 0 : i64, tpu.core_type = #tpu.core_type<tc>, window_params = [{transform_indices = @transform_0, window_bounds = array<i64: 2, 128>}, {pipeline_mode = #tpu.pipeline_mode<synchronous>, transform_indices = @transform_1, window_bounds = array<i64: 16, 2>}, {pipeline_mode = #tpu.pipeline_mode<synchronous>, transform_indices = @transform_2, window_bounds = array<i64: 16, 1>}, {pipeline_mode = #tpu.pipeline_mode<synchronous>, transform_indices = @transform_3, window_bounds = array<i64: 6, 16, 16>}, {pipeline_mode = #tpu.pipeline_mode<synchronous>, transform_indices = @transform_4, window_bounds = array<i64: 3, 16>}, {transform_indices = @transform_5, window_bounds = array<i64: 3, 128>}]} {
    %c0 = arith.constant 0 : index
    %c0_0 = arith.constant 0 : index
    %0 = vector.load %arg1[%c0, %c0_0] : memref<2x128xf32, #tpu.memory_space<vmem>>, vector<2x128xf32>
    %c0_1 = arith.constant 0 : index
    %c0_2 = arith.constant 0 : index
    %1 = vector.load %arg2[%c0_1, %c0_2] : memref<16x2xf32, #tpu.memory_space<vmem>>, vector<16x2xf32>
    %cst = arith.constant dense<0.000000e+00> : vector<16x128xf32>
    %2 = tpu.matmul %1, %0, %cst {dimension_numbers = #tpu.dot_dimension_numbers<[1], [0], [0], [1], [0, 0, 1, 1], [], []>} : vector<16x2xf32>, vector<2x128xf32>, vector<16x128xf32> -> vector<16x128xf32>
    %c0_3 = arith.constant 0 : index
    %c0_4 = arith.constant 0 : index
    %3 = vector.load %arg3[%c0_3, %c0_4] : memref<16x1xf32, #tpu.memory_space<vmem>>, vector<16x1xf32>
    %4 = vector.broadcast %3 : vector<16x1xf32> to vector<16x128xf32>
    %5 = arith.addf %2, %4 : vector<16x128xf32>
    %6 = math.tanh %5 : vector<16x128xf32>
    %c0_5 = arith.constant 0 : index
    %c0_6 = arith.constant 0 : index
    %c0_7 = arith.constant 0 : index
    %7 = vector.load %arg4[%c0_5, %c0_6, %c0_7] : memref<6x16x16xf32, #tpu.memory_space<vmem>>, vector<1x16x16xf32>
    %8 = vector.shape_cast %7 : vector<1x16x16xf32> to vector<16x16xf32>
    %cst_8 = arith.constant dense<0.000000e+00> : vector<16x128xf32>
    %9 = tpu.matmul %8, %6, %cst_8 {dimension_numbers = #tpu.dot_dimension_numbers<[1], [0], [0], [1], [0, 0, 1, 1], [], []>} : vector<16x16xf32>, vector<16x128xf32>, vector<16x128xf32> -> vector<16x128xf32>
    %10 = math.tanh %9 : vector<16x128xf32>
    %c1 = arith.constant 1 : index
    %c0_9 = arith.constant 0 : index
    %c0_10 = arith.constant 0 : index
    %11 = vector.load %arg4[%c1, %c0_9, %c0_10] : memref<6x16x16xf32, #tpu.memory_space<vmem>>, vector<1x16x16xf32>
    %12 = vector.shape_cast %11 : vector<1x16x16xf32> to vector<16x16xf32>
    %cst_11 = arith.constant dense<0.000000e+00> : vector<16x128xf32>
    %13 = tpu.matmul %12, %10, %cst_11 {dimension_numbers = #tpu.dot_dimension_numbers<[1], [0], [0], [1], [0, 0, 1, 1], [], []>} : vector<16x16xf32>, vector<16x128xf32>, vector<16x128xf32> -> vector<16x128xf32>
    %14 = math.tanh %13 : vector<16x128xf32>
    %c2 = arith.constant 2 : index
    %c0_12 = arith.constant 0 : index
    %c0_13 = arith.constant 0 : index
    %15 = vector.load %arg4[%c2, %c0_12, %c0_13] : memref<6x16x16xf32, #tpu.memory_space<vmem>>, vector<1x16x16xf32>
    %16 = vector.shape_cast %15 : vector<1x16x16xf32> to vector<16x16xf32>
    %cst_14 = arith.constant dense<0.000000e+00> : vector<16x128xf32>
    %17 = tpu.matmul %16, %14, %cst_14 {dimension_numbers = #tpu.dot_dimension_numbers<[1], [0], [0], [1], [0, 0, 1, 1], [], []>} : vector<16x16xf32>, vector<16x128xf32>, vector<16x128xf32> -> vector<16x128xf32>
    %18 = math.tanh %17 : vector<16x128xf32>
    %c3 = arith.constant 3 : index
    %c0_15 = arith.constant 0 : index
    %c0_16 = arith.constant 0 : index
    %19 = vector.load %arg4[%c3, %c0_15, %c0_16] : memref<6x16x16xf32, #tpu.memory_space<vmem>>, vector<1x16x16xf32>
    %20 = vector.shape_cast %19 : vector<1x16x16xf32> to vector<16x16xf32>
    %cst_17 = arith.constant dense<0.000000e+00> : vector<16x128xf32>
    %21 = tpu.matmul %20, %18, %cst_17 {dimension_numbers = #tpu.dot_dimension_numbers<[1], [0], [0], [1], [0, 0, 1, 1], [], []>} : vector<16x16xf32>, vector<16x128xf32>, vector<16x128xf32> -> vector<16x128xf32>
    %22 = math.tanh %21 : vector<16x128xf32>
    %c4 = arith.constant 4 : index
    %c0_18 = arith.constant 0 : index
    %c0_19 = arith.constant 0 : index
    %23 = vector.load %arg4[%c4, %c0_18, %c0_19] : memref<6x16x16xf32, #tpu.memory_space<vmem>>, vector<1x16x16xf32>
    %24 = vector.shape_cast %23 : vector<1x16x16xf32> to vector<16x16xf32>
    %cst_20 = arith.constant dense<0.000000e+00> : vector<16x128xf32>
    %25 = tpu.matmul %24, %22, %cst_20 {dimension_numbers = #tpu.dot_dimension_numbers<[1], [0], [0], [1], [0, 0, 1, 1], [], []>} : vector<16x16xf32>, vector<16x128xf32>, vector<16x128xf32> -> vector<16x128xf32>
    %26 = math.tanh %25 : vector<16x128xf32>
    %c5 = arith.constant 5 : index
    %c0_21 = arith.constant 0 : index
    %c0_22 = arith.constant 0 : index
    %27 = vector.load %arg4[%c5, %c0_21, %c0_22] : memref<6x16x16xf32, #tpu.memory_space<vmem>>, vector<1x16x16xf32>
    %28 = vector.shape_cast %27 : vector<1x16x16xf32> to vector<16x16xf32>
    %cst_23 = arith.constant dense<0.000000e+00> : vector<16x128xf32>
    %29 = tpu.matmul %28, %26, %cst_23 {dimension_numbers = #tpu.dot_dimension_numbers<[1], [0], [0], [1], [0, 0, 1, 1], [], []>} : vector<16x16xf32>, vector<16x128xf32>, vector<16x128xf32> -> vector<16x128xf32>
    %30 = math.tanh %29 : vector<16x128xf32>
    %c0_24 = arith.constant 0 : index
    %c0_25 = arith.constant 0 : index
    %31 = vector.load %arg5[%c0_24, %c0_25] : memref<3x16xf32, #tpu.memory_space<vmem>>, vector<3x16xf32>
    %cst_26 = arith.constant dense<0.000000e+00> : vector<3x128xf32>
    %32 = tpu.matmul %31, %30, %cst_26 {dimension_numbers = #tpu.dot_dimension_numbers<[1], [0], [0], [1], [0, 0, 1, 1], [], []>} : vector<3x16xf32>, vector<16x128xf32>, vector<3x128xf32> -> vector<3x128xf32>
    %c0_27 = arith.constant 0 : index
    %c0_28 = arith.constant 0 : index
    %33 = vector.load %arg6[%c0_27, %c0_28] : memref<3x128xf32, #tpu.memory_space<vmem>>, vector<3x128xf32>
    tpu.vector_store %arg6[%c0_27, %c0_28], %32 {strides = array<i32>} : memref<3x128xf32, #tpu.memory_space<vmem>>, vector<3x128xf32>,
    return
  }
  func.func @transform_0(%arg0: i32) -> (i32, i32) {
    %c0_i32 = arith.constant 0 : i32
    %c0_i32_0 = arith.constant 0 : i32
    return %c0_i32, %arg0 : i32, i32
  }
  func.func @transform_1(%arg0: i32) -> (i32, i32) {
    %c0_i32 = arith.constant 0 : i32
    %c0_i32_0 = arith.constant 0 : i32
    %c0_i32_1 = arith.constant 0 : i32
    return %c0_i32, %c0_i32_0 : i32, i32
  }
  func.func @transform_2(%arg0: i32) -> (i32, i32) {
    %c0_i32 = arith.constant 0 : i32
    %c0_i32_0 = arith.constant 0 : i32
    %c0_i32_1 = arith.constant 0 : i32
    return %c0_i32, %c0_i32_0 : i32, i32
  }
  func.func @transform_3(%arg0: i32) -> (i32, i32, i32) {
    %c0_i32 = arith.constant 0 : i32
    %c0_i32_0 = arith.constant 0 : i32
    %c0_i32_1 = arith.constant 0 : i32
    %c0_i32_2 = arith.constant 0 : i32
    return %c0_i32, %c0_i32_0, %c0_i32_1 : i32, i32, i32
  }
  func.func @transform_4(%arg0: i32) -> (i32, i32) {
    %c0_i32 = arith.constant 0 : i32
    %c0_i32_0 = arith.constant 0 : i32
    %c0_i32_1 = arith.constant 0 : i32
    return %c0_i32, %c0_i32_0 : i32, i32
  }
  func.func @transform_5(%arg0: i32) -> (i32, i32) {
    %c0_i32 = arith.constant 0 : i32
    %c0_i32_0 = arith.constant 0 : i32
    return %c0_i32, %arg0 : i32, i32
  }
}

</mosaic_0001>

<bundles_post_ra>
// kernel: mlp_forward.1
= control target key start
LH: loop header
LB: loop body
LE: loop exit
PB: predicated region body
PF: predicated region fallthrough
CT: control target
= control target key end

     0   :  { %10 = vsyncpa [#allocation3], 0  ;;  %s1232_s18 = smov 0   ;;  %s1295_s0 = inlined_call_operand.vmem [shape: f32[2,256], index: 0, kind: input, shape index: {}]   ;;  %s1296_s1 = inlined_call_operand.vmem [shape: f32[16,2], index: 1, kind: input, shape index: {}]   ;;  %s1297_s2 = inlined_call_operand.vmem [shape: f32[16,1], index: 2, kind: input, shape index: {}]   ;;  %s1298_s3 = inlined_call_operand.hbm [shape: f32[6,16,16], index: 3, kind: input, shape index: {}]   ;;  %s1299_s4 = inlined_call_operand.vmem [shape: f32[3,16], index: 4, kind: input, shape index: {}]   ;;  %s1300_s5 = inlined_call_operand.vmem [shape: f32[3,256], index: 5, kind: output, shape index: {}]  }
   0x1 LB: > { %s994_s19 = sadd.s32 4294967295, %s1194_s18   ;;  %p996_p0 = scmp.ge.s32.totalorder %s1194_s18, 1  ;;  %s1194_s18 = sphi %s1232_s18, %s16_s18  }
   0x2   : > { %p157_p1 = scmp.lt.s32.totalorder %s1194_s18, 3  ;;  %s1196_s20 = smov [#allocation2]  }
   0x3   : > { %s175_s21 = sshll.u32 %s1196_s20, 4  ;;  %p1113_p3 = scmp.eq.s32.totalorder %s994_s19, 0  ;;  %s176_s21 = int_to_ptr.vmem [resolvable:$true] %s175_s21 }
   0x4   : > { %p1240_p2 = pnand %p996_p0, %p157_p1  ;;  %s1169_s23 = scalar_lea.vmem %s176_s21, 1536 }
   0x5   : > { %p1170_p7 = scmp.ne.s32.totalorder %s176_s21, %s1169_s23  ;;  %p1177_p10 = scmp.lt.s32.totalorder %s176_s21, %s176_s21 }
   0x6   : > { %p1109_p4 = pneg %p1240_p2  ;;  %p1178_p11 = scmp.lt.s32.totalorder %s1169_s23, %s1169_s23 }
   0x8   : > { %p1110_p5 = pnand %p1113_p3, %p1109_p4  ;;  %p1179_p12 = por %p1178_p11, %p1177_p10 }
   0xa   : > { %p1160_p6 = pneg %p1110_p5 }
   0xc   : > { %p1172_p8 = pnand %p1170_p7, %p1160_p6 }
   0xe   : > { %p1173_p9 = pneg %p1172_p8 }
  0x10   : > { %p1180_p13 = pnand %p1179_p12, %p1173_p9 }
  0x12   : > { %1183 = shalt.err (!%p1180_p13)
}
  0x13   : > { %s1197_s24 = smov 128   ;;  %s1198_s25 = smov 8  }
  0x14   : > { %1112 = dma.hbm_to_vmem [thread:$0]  (!%p1110_p5), %s1298_s3, 1536, %s176_s21, [#allocation3], %s1197_s24, %s1197_s24, %s1198_s25  }
  0x15   : > { %201 = sbr.rel (%p1240_p2) target bundleno = 1708 (0x6ac), region = 40 }
  0x1a   : > { %1189 = dma.done.wait (%p1113_p3), [#allocation3], 1536  }
  0x1b   : > { %1191 = vsyncadd (%p1113_p3), [#allocation3], 4294965760  ;;  %p227_p0 = scmp.lt.s32.totalorder %s994_s19, 1  ;;  %v1199_v0 = vmov 0   ;;  %vm257_vm0 = vcmask 1041408   ;;  %vm250_vm1 = vcmask 15360  }
  0x1c   : > { %1129 = vset.pattern.permute.xlu0 %v1199_v0  ;;  %v236_v2 = vld [vmem:[%s1296_s1] sm:$0xff]  ;;  %v237_v3 = vld [vmem:[%s1296_s1 + $0x8] sm:$0xff]  ;;  %vm340_vm2 = vcmask 130048   ;;  %v425_v16 = vld [vmem:[#allocation2 + $0x10] sm:$0xff]  ;;  %v1200_v46 = vmov 0.0   ;;  %vm1201_vm3 = vmmov 0  }
  0x1d   : > { %s1303_s19 = smov (!%p227_p0, %s994_s19), 1  ;;  %1053 = vmatprep.mubr.msk.f32.mxu0 %vm250_vm1, %v236_v2  ;;  %v239_v4 = vld [vmem:[%s1297_s2 + $0x8] sm:$0xff]  ;;  %v238_v5 = vld [vmem:[%s1297_s2] sm:$0xff]  ;;  %v426_v21 = vld [vmem:[#allocation2 + $0x18] sm:$0xff] }
  0x1e   : > { %s1001_s28 = sshll.u32 %s1303_s19, 1  ;;  %247 = vperm.xlu0 %1129, %v239_v4   ;;  %v338_v6 = vld [vmem:[#allocation2] sm:$0xff]  ;;  %v339_v15 = vld [vmem:[#allocation2 + $0x8] sm:$0xff]  ;;  %v597_v28 = vld [vmem:[#allocation2 + $0x30] sm:$0xff]  ;;  %s1002_s17 = sshll.u32 %s1303_s19, 2 }
  0x1f   : > { %s230_s6 = scalar_lea.vmem %s1295_s0, %s1001_s28  ;;  %1060 = vmatprep.mubr.msk.f32.mxu1 %vm340_vm2, %v338_v6  ;;  %v511_v22 = vld [vmem:[#allocation2 + $0x20] sm:$0xff]  ;;  %v512_v27 = vld [vmem:[#allocation2 + $0x28] sm:$0xff]  ;;  %v598_v33 = vld [vmem:[#allocation2 + $0x38] sm:$0xff]  ;;  %s234_s22 = scalar_lea.vmem %s1300_s5, %s1002_s17 }
  0x20   : > { %v235_v1 = vld [vmem:[%s230_s6] sm:$0x3]  ;;  %v684_v39 = vld [vmem:[#allocation2 + $0x48] sm:$0xff]  ;;  %v769_v40 = vld [vmem:[#allocation2 + $0x50] sm:$0xff] }
  0x21   : > { %1051 = vmatprep.subr.msk.mxu0 %vm257_vm0, %v235_v1  ;;  %v683_v34 = vld [vmem:[#allocation2 + $0x40] sm:$0xff]  ;;  %v770_v45 = vld [vmem:[#allocation2 + $0x58] sm:$0xff] }
  0x22   : > { %1052 = vmatpush3.msk.msra.mxu0 %vm257_vm0, %v235_v1  ;;  %242 = vperm.xlu0 %1129, %v238_v5   ;;  %v854_v50 = vld [vmem:[%s1299_s4] sm:$0x7] }
  0x23   : > { %1054 = vmatmul.mubr.msk.f32.vlgmr.msra.gmra.mxu0 %vm250_vm1, %v237_v3 }
  0x24   : > { %1067 = vmatprep.mubr.msk.f32.mxu0 %vm340_vm2, %v425_v16 }
  0x99   : > { %v248_v7 = vpop.permute.xlu0 %247 }
  0x9d   : > { %v243_v10 = vpop.permute.xlu0 %242 }
  0xe3   : > { %v1055_v8 = vpop.f32.mrf.mxu0 }
  0xe4   : > { %v333_v9 = vadd.f32 %v1055_v8, %v248_v7 }
  0xe5   : > { %v327_v11 = vpop.f32.mrf.mxu0 }
  0xe6   : > { %1130 = vtanh.f32 %v333_v9  ;;  %v328_v12 = vadd.f32 %v327_v11, %v243_v10 }
  0xe8   : > { %1132 = vtanh.f32 %v328_v12 }
  0xf3   : > { %v1131_v13 = vpop.eup %1130 }
  0xf4   : > { %1056 = vmatprep.subr.mxu1 %v1131_v13 }
  0xf5   : > { %v1133_v14 = vpop.eup %1132  ;;  %1057 = vmatpush3.msra.mxu1 %v1131_v13 }
  0xf6   : > { %1058 = vmatprep.subr.mxu1 %v1133_v14 }
  0xf7   : > { %1059 = vmatpush3.msra.mxu1 %v1133_v14 }
  0xf8   : > { %1061 = vmatmul.mubr.msk.f32.vlgmr.msra.gmra.mxu1 %vm340_vm2, %v339_v15 }
  0xf9   : > { %1074 = vmatprep.mubr.msk.f32.mxu1 %vm340_vm2, %v511_v22 }
 0x1b8   : > { %v1062_v17 = vpop.f32.mrf.mxu1 }
 0x1b9   : > { %1134 = vtanh.f32 %v1062_v17 }
 0x1ba   : > { %v413_v18 = vpop.f32.mrf.mxu1 }
 0x1bb   : > { %1136 = vtanh.f32 %v413_v18 }
 0x1c6   : > { %v1135_v19 = vpop.eup %1134 }
 0x1c7   : > { %1063 = vmatprep.subr.mxu0 %v1135_v19 }
 0x1c8   : > { %v1137_v20 = vpop.eup %1136  ;;  %1064 = vmatpush3.msra.mxu0 %v1135_v19 }
 0x1c9   : > { %1065 = vmatprep.subr.mxu0 %v1137_v20 }
 0x1ca   : > { %1066 = vmatpush3.msra.mxu0 %v1137_v20 }
 0x1cb   : > { %1068 = vmatmul.mubr.msk.f32.vlgmr.msra.gmra.mxu0 %vm340_vm2, %v426_v21 }
 0x1cc   : > { %1081 = vmatprep.mubr.msk.f32.mxu0 %vm340_vm2, %v597_v28 }
 0x28b   : > { %v1069_v23 = vpop.f32.mrf.mxu0 }
 0x28c   : > { %1138 = vtanh.f32 %v1069_v23 }
 0x28d   : > { %v499_v24 = vpop.f32.mrf.mxu0 }
 0x28e   : > { %1140 = vtanh.f32 %v499_v24 }
 0x299   : > { %v1139_v25 = vpop.eup %1138 }
 0x29a   : > { %1070 = vmatprep.subr.mxu1 %v1139_v25 }
 0x29b   : > { %v1141_v26 = vpop.eup %1140  ;;  %1071 = vmatpush3.msra.mxu1 %v1139_v25 }
 0x29c   : > { %1072 = vmatprep.subr.mxu1 %v1141_v26 }
 0x29d   : > { %1073 = vmatpush3.msra.mxu1 %v1141_v26 }
 0x29e   : > { %1075 = vmatmul.mubr.msk.f32.vlgmr.msra.gmra.mxu1 %vm340_vm2, %v512_v27 }
 0x29f   : > { %1088 = vmatprep.mubr.msk.f32.mxu1 %vm340_vm2, %v683_v34 }
 0x35e   : > { %v1076_v29 = vpop.f32.mrf.mxu1 }
 0x35f   : > { %1142 = vtanh.f32 %v1076_v29 }
 0x360   : > { %v585_v30 = vpop.f32.mrf.mxu1 }
 0x361   : > { %1144 = vtanh.f32 %v585_v30 }
 0x36c   : > { %v1143_v31 = vpop.eup %1142 }
 0x36d   : > { %1077 = vmatprep.subr.mxu0 %v1143_v31 }
 0x36e   : > { %v1145_v32 = vpop.eup %1144  ;;  %1078 = vmatpush3.msra.mxu0 %v1143_v31 }
 0x36f   : > { %1079 = vmatprep.subr.mxu0 %v1145_v32 }
 0x370   : > { %1080 = vmatpush3.msra.mxu0 %v1145_v32 }
 0x371   : > { %1082 = vmatmul.mubr.msk.f32.vlgmr.msra.gmra.mxu0 %vm340_vm2, %v598_v33 }
 0x372   : > { %1095 = vmatprep.mubr.msk.f32.mxu0 %vm340_vm2, %v769_v40 }
 0x431   : > { %v1083_v35 = vpop.f32.mrf.mxu0 }
 0x432   : > { %1146 = vtanh.f32 %v1083_v35 }
 0x433   : > { %v671_v36 = vpop.f32.mrf.mxu0 }
 0x434   : > { %1148 = vtanh.f32 %v671_v36 }
 0x43f   : > { %v1147_v37 = vpop.eup %1146 }
 0x440   : > { %1084 = vmatprep.subr.mxu1 %v1147_v37 }
 0x441   : > { %v1149_v38 = vpop.eup %1148  ;;  %1085 = vmatpush3.msra.mxu1 %v1147_v37 }
 0x442   : > { %1086 = vmatprep.subr.mxu1 %v1149_v38 }
 0x443   : > { %1087 = vmatpush3.msra.mxu1 %v1149_v38 }
 0x444   : > { %1089 = vmatmul.mubr.msk.f32.vlgmr.msra.gmra.mxu1 %vm340_vm2, %v684_v39  ;;  %1098 = vmatprep.subr.mxu1 %v1200_v46 }
 0x445   : > { %1102 = vmatprep.mubr.msk.f32.mxu1 %vm1201_vm3, %v1200_v46 }
 0x504   : > { %v1090_v41 = vpop.f32.mrf.mxu1 }
 0x505   : > { %1150 = vtanh.f32 %v1090_v41 }
 0x506   : > { %v757_v42 = vpop.f32.mrf.mxu1 }
 0x507   : > { %1152 = vtanh.f32 %v757_v42 }
 0x512   : > { %v1151_v43 = vpop.eup %1150 }
 0x513   : > { %1091 = vmatprep.subr.mxu0 %v1151_v43 }
 0x514   : > { %v1153_v44 = vpop.eup %1152  ;;  %1092 = vmatpush3.msra.mxu0 %v1151_v43 }
 0x515   : > { %1093 = vmatprep.subr.mxu0 %v1153_v44 }
 0x516   : > { %1094 = vmatpush3.msra.mxu0 %v1153_v44 }
 0x517   : > { %1096 = vmatmul.mubr.msk.f32.vlgmr.msra.gmra.mxu0 %vm340_vm2, %v770_v45 }
 0x5d7   : > { %v1097_v47 = vpop.f32.mrf.mxu0 }
 0x5d8   : > { %1154 = vtanh.f32 %v1097_v47 }
 0x5d9   : > { %v843_v48 = vpop.f32.mrf.mxu0 }
 0x5da   : > { %1156 = vtanh.f32 %v843_v48 }
 0x5e5   : > { %v1155_v49 = vpop.eup %1154 }
 0x5e6   : > { %1099 = vmatpush3.msra.mxu1 %v1155_v49 }
 0x5e7   : > { %v1157_v51 = vpop.eup %1156  ;;  %1100 = vmatprep.subr.mxu1 %v1200_v46 }
 0x5e8   : > { %1101 = vmatpush3.msra.mxu1 %v1157_v51 }
 0x5e9   : > { %1103 = vmatmul.mubr.msk.f32.vlgmr.msra.gmra.mxu1 %vm340_vm2, %v854_v50 }
 0x6a9   : > { %v924_v52 = vpop.f32.mrf.mxu1 }
 0x6aa   : > { %928 = vst [vmem:[%s234_s22] sm:$0x7] %v924_v52 }
 0x6ab   : > { %v1104_v53 = vpop.f32.mrf.mxu1 }
 0x6ac PF: > { %s16_s18 = sadd.s32 1, %s1194_s18  }
 0x6ad   : > { %p13_p1 = scmp.ge.s32.totalorder %s16_s18, 4  }
 0x6af   :  { %15 = sbr.rel (!%p13_p1) target bundleno = 1 (0x1), region = 80 }
 0x6b4   :  { %948 = vsyncpa [#allocation3], 1 }
 0x6b5   :  { %950 = vsyncpa [#allocation3 + $0x1], 1 }

</bundles_post_ra>
